<compile_context>
chip_gen: v7x
topology: tpu7x:2x2x1
jax: 0.10.0
libtpu: 0.0.40
codegen_flags: <defaults>
</compile_context>

<pallas_src>
import math
import random

import numpy as np
import jax
import jax.numpy as jnp
from jax.experimental import pallas as pl
from jax.experimental.pallas import tpu as pltpu


# ----------------------------- host-side helpers -----------------------------

def _gaussian_kernel1d(kernel_size, sigma):
    """Matches torchvision's _get_gaussian_kernel1d (normalized Gaussian taps)."""
    half = (kernel_size - 1) * 0.5
    xs = [-half + i for i in range(kernel_size)]
    pdf = [math.exp(-0.5 * (x / sigma) ** 2) for x in xs]
    s = sum(pdf)
    return tuple(p / s for p in pdf)


def _reflect(q, size):
    """Reflect index q into [0, size) (jnp.pad mode='reflect' / torch 'reflect')."""
    if size == 1:
        return 0
    while q < 0 or q > size - 1:
        if q < 0:
            q = -q
        elif q > size - 1:
            q = 2 * (size - 1) - q
    return q


def _band_matrix(size, weights):
    """(size, size) matrix M with M[i, q] = sum of taps hitting source row q for
    output row i, reflect padding folded in:  (M @ x)[i] = sum_j w[j] * x_pad[i+j]."""
    k = len(weights)
    pad = k // 2
    m = np.zeros((size, size), dtype=np.float32)
    for i in range(size):
        for j in range(k):
            m[i, _reflect(i + j - pad, size)] += weights[j]
    return m


def _sample_randomness(key, py_rng, n, h, w, *, prob, kernel_size_lower,
                       kernel_size_upper, sigma_lower, sigma_upper,
                       thresh_lower, thresh_upper):
    """All randomness of DepthHoles.forward (kernel size / sigma are host-static)."""
    kernel_size = py_rng.choice(
        list(range(kernel_size_lower, kernel_size_upper + 1, 2)))
    sigma = py_rng.uniform(sigma_lower, sigma_upper)
    k_noise, k_thresh, k_keep = jax.random.split(key, 3)
    noise = jax.random.uniform(k_noise, (n, h, w), dtype=jnp.float32)
    thresh = jax.random.uniform(k_thresh, (n,), dtype=jnp.float32,
                                minval=thresh_lower, maxval=thresh_upper)
    keep = jax.random.uniform(k_keep, (n,), dtype=jnp.float32) < prob
    return kernel_size, sigma, noise, thresh, keep


# --------------------------------- kernels -----------------------------------

def _make_blur_kernel(nb, n_total):
    def _blur_kernel(x_ref, a_ref, b_ref, o_ref, mn_ref, mx_ref):
        # x_ref: (nb, h, w) noise, a_ref: (h, h), b_ref: (w, w) band matrices.
        # o_ref: (nb, h, w) blurred, mn_ref/mx_ref: (1, 8, 128) per-block partials.
        a = a_ref[...]
        b = b_ref[...]
        base = pl.program_id(0) * nb
        run_min = jnp.full((), jnp.inf, jnp.float32)
        run_max = jnp.full((), -jnp.inf, jnp.float32)
        for i in range(nb):                       # static unroll, nb <= 8
            acc = jnp.dot(a, x_ref[i], preferred_element_type=jnp.float32)
            out = jnp.dot(acc, b, preferred_element_type=jnp.float32)
            o_ref[i] = out
            # Mask out garbage batch rows of a ragged last block so the global
            # min/max only sees real images (Pallas drops their writeback anyway).
            valid = (base + i) < n_total
            run_min = jnp.minimum(run_min, jnp.where(valid, jnp.min(out), jnp.inf))
            run_max = jnp.maximum(run_max, jnp.where(valid, jnp.max(out), -jnp.inf))
        mn_ref[...] = jnp.broadcast_to(run_min, (1, 8, 128))
        mx_ref[...] = jnp.broadcast_to(run_max, (1, 8, 128))

    return _blur_kernel


def _mask_kernel(x_ref, t_ref, o_ref):
    # x_ref: (nb, col_tile) blurred noise; t_ref: (nb, 1) effective threshold column.
    o_ref[...] = (x_ref[...] > t_ref[...]).astype(jnp.int8)


# --------------------------------- wrappers ----------------------------------

def _gaussian_blur(noise, kernel_size, sigma):
    """Separable Gaussian blur (reflect padding) via banded MXU matmuls.

    noise: f32 (N, H, W).  Returns (blurred (N,H,W), global_min, global_max).
    """
    n, h, w = noise.shape
    weights = _gaussian_kernel1d(kernel_size, sigma)
    band_v = jnp.asarray(_band_matrix(h, weights))        # (h, h): acc = A @ x
    band_h = jnp.asarray(_band_matrix(w, weights).T)      # (w, w): out = acc @ B

    # Images per grid step: fill the block, but (a) keep >= 2 grid steps so both
    # v7x TensorCores get work, and (b) budget the double-buffered in+out blocks
    # PLUS band matrices PLUS per-image matmul temporaries under ~16 MiB (explicit
    # vmem_limit_bytes below gives headroom on every generation).
    nb = min(n, 8)
    nb = min(nb, max(1, -(-n // 2)))                      # ceil(n/2): >=2 steps
    band_bytes = 4 * (h * h + w * w)

    def _est(nb_):
        io_block = nb_ * h * w * 4 * 2                    # one in + one out buffer
        return 2 * io_block + 2 * band_bytes + nb_ * h * w * 4

    while nb > 1 and _est(nb) > 16 * 1024 * 1024:
        nb //= 2
    num_blocks = pl.cdiv(n, nb)

    blurred, mins, maxs = pl.pallas_call(
        _make_blur_kernel(nb, n),
        out_shape=(jax.ShapeDtypeStruct((n, h, w), jnp.float32),
                   jax.ShapeDtypeStruct((num_blocks, 8, 128), jnp.float32),
                   jax.ShapeDtypeStruct((num_blocks, 8, 128), jnp.float32)),
        grid=(num_blocks,),
        in_specs=[pl.BlockSpec((nb, h, w), lambda i: (i, 0, 0)),
                  pl.BlockSpec((h, h), lambda i: (0, 0)),
                  pl.BlockSpec((w, w), lambda i: (0, 0))],
        out_specs=[pl.BlockSpec((nb, h, w), lambda i: (i, 0, 0)),
                   pl.BlockSpec((1, 8, 128), lambda i: (i, 0, 0)),
                   pl.BlockSpec((1, 8, 128), lambda i: (i, 0, 0))],
        compiler_params=pltpu.CompilerParams(
            dimension_semantics=("parallel",),
            vmem_limit_bytes=40 * 1024 * 1024),
    )(noise, band_v, band_h)

    return blurred, jnp.min(mins), jnp.max(maxs)


def _pick_col_tile(hw_pad, cap=16384):
    """Largest 128-multiple divisor of hw_pad <= cap, preferring >= 2 column tiles."""
    units = hw_pad // 128
    best = 1
    for d in range(1, units + 1):
        if units % d != 0:
            continue
        if d * 128 > cap:
            continue
        if (units // d) >= 2 or units == 1:
            best = max(best, d)
    return best * 128


def _threshold_mask(blurred, t_col):
    """mask = blurred > t_col (per-image column), lane-dense tiled elementwise, int8 out."""
    n, h, w = blurred.shape
    hw = h * w
    hw_pad = pl.cdiv(hw, 128) * 128              # 128-aligned lane dim (no vst.msk)
    flat = blurred.reshape(n, hw)
    if hw_pad != hw:
        # TODO(synk): for non-128-aligned H*W, an in-kernel masked tail store would
        # avoid this extra HBM copy.
        flat = jnp.pad(flat, ((0, 0), (0, hw_pad - hw)))

    # Row block: full batch when small (block dim == array dim is always legal);
    # otherwise a multiple of 8 (32 keeps packed int8 stores unmasked).
    if n <= 8:
        nb = n
    elif n >= 32:
        nb = 32
    else:
        nb = 8
    col_tile = _pick_col_tile(hw_pad)

    mask_i8 = pl.pallas_call(
        _mask_kernel,
        out_shape=jax.ShapeDtypeStruct((n, hw_pad), jnp.int8),
        grid=(pl.cdiv(n, nb), hw_pad // col_tile),
        in_specs=[
            pl.BlockSpec((nb, col_tile), lambda i, j: (i, j)),
            pl.BlockSpec((nb, 1), lambda i, j: (i, 0)),
        ],
        out_specs=pl.BlockSpec((nb, col_tile), lambda i, j: (i, j)),
        compiler_params=pltpu.CompilerParams(
            dimension_semantics=("parallel", "parallel")),
    )(flat, t_col)

    return mask_i8[:, :hw].reshape(n, h, w).astype(jnp.bool_)


def depth_holes(depths, key, py_rng, *, prob=0.5, kernel_size_lower=3,
                kernel_size_upper=27, sigma_lower=1.0, sigma_upper=7.0,
                thresh_lower=0.6, thresh_upper=0.9):
    """Pallas DepthHoles forward. depths: (N, 1, H, W) -> bool mask (N, 1, H, W)."""
    n, _, h, w = depths.shape
    kernel_size, sigma, noise, thresh, keep = _sample_randomness(
        key, py_rng, n, h, w, prob=prob,
        kernel_size_lower=kernel_size_lower, kernel_size_upper=kernel_size_upper,
        sigma_lower=sigma_lower, sigma_upper=sigma_upper,
        thresh_lower=thresh_lower, thresh_upper=thresh_upper)

    blurred, gmin, gmax = _gaussian_blur(noise, kernel_size, sigma)

    # Fold global min/max normalization and the per-image keep mask into a
    # per-image effective threshold:  (x-mn)/(mx-mn) > t  <=>  x > t*(mx-mn)+mn
    # (differs from the reference only by FP rounding at the decision boundary),
    # and dropped images get +inf so the compare is all-False.
    t_eff = jnp.where(keep, thresh * (gmax - gmin) + gmin, jnp.inf)
    t_col = t_eff.reshape(n, 1).astype(jnp.float32)

    mask = _threshold_mask(blurred, t_col)
    return mask.reshape(n, 1, h, w)


# -------------------------- pure-JAX reference check --------------------------

def _reference(depths, key, py_rng, **cfg):
    n, _, h, w = depths.shape
    kernel_size, sigma, noise, thresh, keep = _sample_randomness(
        key, py_rng, n, h, w, **cfg)
    pad = kernel_size // 2
    xpad = jnp.pad(noise, ((0, 0), (pad, pad), (pad, pad)), mode="reflect")
    wgt = _gaussian_kernel1d(kernel_size, sigma)
    acc = wgt[0] * xpad[:, 0:h, :]
    for j in range(1, kernel_size):
        acc = acc + wgt[j] * xpad[:, j:j + h, :]
    blur = wgt[0] * acc[:, :, 0:w]
    for j in range(1, kernel_size):
        blur = blur + wgt[j] * acc[:, :, j:j + w]
    mn, mx = jnp.min(blur), jnp.max(blur)
    norm = (blur - mn) / (mx - mn)
    mask = (norm > thresh[:, None, None]) & keep[:, None, None]
    return mask.reshape(n, 1, h, w), norm, thresh


if __name__ == "__main__":
    cfg = dict(prob=0.5, kernel_size_lower=3, kernel_size_upper=27,
               sigma_lower=1.0, sigma_upper=7.0, thresh_lower=0.6, thresh_upper=0.9)

    N, H, W = 2, 16, 16
    root = jax.random.PRNGKey(0)
    k_depth, k_fwd = jax.random.split(root)
    # depths are only consumed for shape/device in the reference module.
    depths = jax.random.uniform(k_depth, (N, 1, H, W), dtype=jnp.float32) * 10.0

    mask = depth_holes(depths, k_fwd, random.Random(0), **cfg)
    mask = jax.block_until_ready(mask)

    # Reference with identical randomness (fresh host RNG with the same seed).
    mask_ref, norm_ref, thresh_ref = _reference(depths, k_fwd, random.Random(0), **cfg)
    # Ignore elements sitting exactly on the threshold boundary (fp-order ties).
    boundary = (jnp.abs(norm_ref - thresh_ref[:, None, None]) < 1e-5).reshape(N, 1, H, W)
    mismatch = (mask != mask_ref) & ~boundary
    assert not bool(jnp.any(mismatch)), "DepthHoles mask mismatch vs reference"

    print("KERNEL_OK")
</pallas_src>

<mosaic_0001>
module attributes {stable_mosaic.version = 11 : i64} {
  func.func @_blur_kernel(%arg0: i32, %arg1: memref<1x16x16xf32, #tpu.memory_space<vmem>>, %arg2: memref<16x16xf32, #tpu.memory_space<vmem>>, %arg3: memref<16x16xf32, #tpu.memory_space<vmem>>, %arg4: memref<1x16x16xf32, #tpu.memory_space<vmem>>, %arg5: memref<1x8x128xf32, #tpu.memory_space<vmem>>, %arg6: memref<1x8x128xf32, #tpu.memory_space<vmem>>) attributes {dimension_semantics = [#tpu.dimension_semantics<parallel>], iteration_bounds = array<i64: 2>, scalar_prefetch = 0 : i64, scratch_operands = 0 : i64, tpu.core_type = #tpu.core_type<tc>, window_params = [{transform_indices = @transform_0, window_bounds = array<i64: 1, 16, 16>}, {pipeline_mode = #tpu.pipeline_mode<synchronous>, transform_indices = @transform_1, window_bounds = array<i64: 16, 16>}, {pipeline_mode = #tpu.pipeline_mode<synchronous>, transform_indices = @transform_2, window_bounds = array<i64: 16, 16>}, {transform_indices = @transform_3, window_bounds = array<i64: 1, 16, 16>}, {transform_indices = @transform_4, window_bounds = array<i64: 1, 8, 128>}, {transform_indices = @transform_5, window_bounds = array<i64: 1, 8, 128>}]} {
    %c0 = arith.constant 0 : index
    %c0_0 = arith.constant 0 : index
    %0 = vector.load %arg2[%c0, %c0_0] : memref<16x16xf32, #tpu.memory_space<vmem>>, vector<16x16xf32>
    %c0_1 = arith.constant 0 : index
    %c0_2 = arith.constant 0 : index
    %1 = vector.load %arg3[%c0_1, %c0_2] : memref<16x16xf32, #tpu.memory_space<vmem>>, vector<16x16xf32>
    %c1_i32 = arith.constant 1 : i32
    %2 = arith.muli %arg0, %c1_i32 : i32
    %c0_3 = arith.constant 0 : index
    %c0_4 = arith.constant 0 : index
    %c0_5 = arith.constant 0 : index
    %3 = vector.load %arg1[%c0_3, %c0_4, %c0_5] : memref<1x16x16xf32, #tpu.memory_space<vmem>>, vector<1x16x16xf32>
    %4 = vector.shape_cast %3 : vector<1x16x16xf32> to vector<16x16xf32>
    %cst = arith.constant dense<0.000000e+00> : vector<16x16xf32>
    %5 = tpu.matmul %0, %4, %cst {dimension_numbers = #tpu.dot_dimension_numbers<[1], [0], [0], [1], [0, 0, 1, 1], [], []>} : vector<16x16xf32>, vector<16x16xf32>, vector<16x16xf32> -> vector<16x16xf32>
    %cst_6 = arith.constant dense<0.000000e+00> : vector<16x16xf32>
    %6 = tpu.matmul %5, %1, %cst_6 {dimension_numbers = #tpu.dot_dimension_numbers<[1], [0], [0], [1], [0, 0, 1, 1], [], []>} : vector<16x16xf32>, vector<16x16xf32>, vector<16x16xf32> -> vector<16x16xf32>
    %c0_7 = arith.constant 0 : index
    %c0_8 = arith.constant 0 : index
    %c0_9 = arith.constant 0 : index
    %7 = vector.load %arg4[%c0_7, %c0_8, %c0_9] : memref<1x16x16xf32, #tpu.memory_space<vmem>>, vector<1x16x16xf32>
    %8 = vector.shape_cast %7 : vector<1x16x16xf32> to vector<16x16xf32>
    %9 = vector.shape_cast %6 : vector<16x16xf32> to vector<1x16x16xf32>
    tpu.vector_store %arg4[%c0_7, %c0_8, %c0_9], %9 {strides = array<i32>} : memref<1x16x16xf32, #tpu.memory_space<vmem>>, vector<1x16x16xf32>,
    %c0_i32 = arith.constant 0 : i32
    %10 = arith.addi %2, %c0_i32 : i32
    %c2_i32 = arith.constant 2 : i32
    %11 = arith.cmpi slt, %10, %c2_i32 : i32
    %12 = vector.shape_cast %6 : vector<16x16xf32> to vector<1x16x16xf32>
    %cst_10 = arith.constant dense<0x7F800000> : vector<1xf32>
    %13 = vector.multi_reduction <minimumf>, %12, %cst_10 [1, 2] : vector<1x16x16xf32> to vector<1xf32>
    %14 = vector.shape_cast %13 : vector<1xf32> to vector<1x1x1xf32>
    %15 = vector.extract %14[0, 0, 0] : f32 from vector<1x1x1xf32>
    %cst_11 = arith.constant 0x7F800000 : f32
    %16 = arith.select %11, %15, %cst_11 : f32
    %cst_12 = arith.constant 0x7F800000 : f32
    %17 = arith.minimumf %cst_12, %16 : f32
    %18 = vector.shape_cast %6 : vector<16x16xf32> to vector<1x16x16xf32>
    %cst_13 = arith.constant dense<0xFF800000> : vector<1xf32>
    %19 = vector.multi_reduction <maximumf>, %18, %cst_13 [1, 2] : vector<1x16x16xf32> to vector<1xf32>
    %20 = vector.shape_cast %19 : vector<1xf32> to vector<1x1x1xf32>
    %21 = vector.extract %20[0, 0, 0] : f32 from vector<1x1x1xf32>
    %cst_14 = arith.constant 0xFF800000 : f32
    %22 = arith.select %11, %21, %cst_14 : f32
    %cst_15 = arith.constant 0xFF800000 : f32
    %23 = arith.maximumf %cst_15, %22 : f32
    %24 = vector.broadcast %17 : f32 to vector<1x8x128xf32>
    %c0_16 = arith.constant 0 : index
    %c0_17 = arith.constant 0 : index
    %c0_18 = arith.constant 0 : index
    %25 = vector.load %arg5[%c0_16, %c0_17, %c0_18] : memref<1x8x128xf32, #tpu.memory_space<vmem>>, vector<1x8x128xf32>
    tpu.vector_store %arg5[%c0_16, %c0_17, %c0_18], %24 {strides = array<i32>} : memref<1x8x128xf32, #tpu.memory_space<vmem>>, vector<1x8x128xf32>,
    %26 = vector.broadcast %23 : f32 to vector<1x8x128xf32>
    %c0_19 = arith.constant 0 : index
    %c0_20 = arith.constant 0 : index
    %c0_21 = arith.constant 0 : index
    %27 = vector.load %arg6[%c0_19, %c0_20, %c0_21] : memref<1x8x128xf32, #tpu.memory_space<vmem>>, vector<1x8x128xf32>
    tpu.vector_store %arg6[%c0_19, %c0_20, %c0_21], %26 {strides = array<i32>} : memref<1x8x128xf32, #tpu.memory_space<vmem>>, vector<1x8x128xf32>,
    return
  }
  func.func @transform_0(%arg0: i32) -> (i32, i32, i32) {
    %c0_i32 = arith.constant 0 : i32
    %c0_i32_0 = arith.constant 0 : i32
    %c0_i32_1 = arith.constant 0 : i32
    return %arg0, %c0_i32, %c0_i32_0 : i32, i32, i32
  }
  func.func @transform_1(%arg0: i32) -> (i32, i32) {
    %c0_i32 = arith.constant 0 : i32
    %c0_i32_0 = arith.constant 0 : i32
    %c0_i32_1 = arith.constant 0 : i32
    return %c0_i32, %c0_i32_0 : i32, i32
  }
  func.func @transform_2(%arg0: i32) -> (i32, i32) {
    %c0_i32 = arith.constant 0 : i32
    %c0_i32_0 = arith.constant 0 : i32
    %c0_i32_1 = arith.constant 0 : i32
    return %c0_i32, %c0_i32_0 : i32, i32
  }
  func.func @transform_3(%arg0: i32) -> (i32, i32, i32) {
    %c0_i32 = arith.constant 0 : i32
    %c0_i32_0 = arith.constant 0 : i32
    %c0_i32_1 = arith.constant 0 : i32
    return %arg0, %c0_i32, %c0_i32_0 : i32, i32, i32
  }
  func.func @transform_4(%arg0: i32) -> (i32, i32, i32) {
    %c0_i32 = arith.constant 0 : i32
    %c0_i32_0 = arith.constant 0 : i32
    %c0_i32_1 = arith.constant 0 : i32
    return %arg0, %c0_i32, %c0_i32_0 : i32, i32, i32
  }
  func.func @transform_5(%arg0: i32) -> (i32, i32, i32) {
    %c0_i32 = arith.constant 0 : i32
    %c0_i32_0 = arith.constant 0 : i32
    %c0_i32_1 = arith.constant 0 : i32
    return %arg0, %c0_i32, %c0_i32_0 : i32, i32, i32
  }
}

</mosaic_0001>

<bundles_post_ra>
// kernel: tpu_custom_call.1
= control target key start
LH: loop header
LB: loop body
LE: loop exit
PB: predicated region body
PF: predicated region fallthrough
CT: control target
= control target key end

     0   :  { %11 = vsyncpa [#allocation3], 0  ;;  %s1430_s0 = inlined_call_operand.hbm [shape: f32[2,16,16], index: 0, kind: input, shape index: {}]   ;;  %s1431_s1 = inlined_call_operand.hbm [shape: f32[16,16], index: 1, kind: input, shape index: {}]   ;;  %s1432_s2 = inlined_call_operand.hbm [shape: f32[16,16], index: 2, kind: input, shape index: {}]   ;;  %s1433_s3 = inlined_call_operand.hbm [shape: f32[2,16,16], index: 3, kind: output, shape index: {0}]   ;;  %s1434_s4 = inlined_call_operand.hbm [shape: f32[2,8,128], index: 4, kind: output, shape index: {1}]   ;;  %s1435_s5 = inlined_call_operand.hbm [shape: f32[2,8,128], index: 5, kind: output, shape index: {2}]  }
   0x1   :  { %13 = vsyncpa [#allocation3 + $0x1], 0 }
   0x2   :  { %14 = vsyncpa [#allocation6], 0 }
   0x3   :  { %15 = vsyncpa [#allocation4], 0 }
   0x4   :  { %17 = vsyncpa [#allocation4 + $0x1], 0 }
   0x5   :  { %18 = vsyncpa [#allocation10], 0 }
   0x6   :  { %20 = vsyncpa [#allocation10 + $0x1], 0  ;;  %s1098_s18 = smov 0   ;;  %s1100_s19 = smov 0  }
   0x7   :  { %s1102_s20 = smov 0   ;;  %s1104_s21 = smov 0  }
   0x8 LB: > { %s1119_s22 = sadd.s32 4294967295, %s1056_s21   ;;  %s695_s23 = sadd.s32 4294967294, %s1056_s21   ;;  %s1056_s21 = sphi %s1104_s21, %s1455_s21   ;;  %s1052_s20 = sphi %s1102_s20, %s1454_s20   ;;  %s1048_s19 = sphi %s1100_s19, %s1453_s19   ;;  %s1044_s18 = sphi %s1098_s18, %s1452_s18  }
   0x9   : > { %p46_p0 = scmp.ne.s32.totalorder %s1048_s19, %s1044_s18  ;;  %p1436_p1 = scmp.eq.s32.totalorder %s1119_s22, 0 }
   0xa   : > { %p118_p3 = scmp.eq.s32.totalorder %s695_s23, 1  ;;  %p696_p5 = scmp.ge.s32.totalorder %s1056_s21, 1 }
   0xb   : > { %p1130_p4 = por %p1436_p1, %p46_p0  ;;  %p177_p7 = scmp.lt.s32.totalorder %s1056_s21, 3 }
   0xc   : > { %p1135_p6 = por %p118_p3, %p46_p0  ;;  %s1058_s27 = smov [#allocation5]  }
   0xd   : > { %s1439_s24 = scalar_select %p1130_p4, 1, 0 }
   0xe   : > { %s1440_s25 = scalar_select %p1135_p6, 1, 0 }
   0xf   : > { %p1140_p8 = pnand %p696_p5, %p177_p7  ;;  %s189_s28 = sshll.u32 %s1058_s27, 4  ;;  %s1144_s28 = int_to_ptr.vmem [resolvable:$true] %s189_s28 }
  0x10   : > { %s1059_s30 = smov [#allocation7]   ;;  %s840_s9 = scalar_lea.hbm %s1431_s1, 256 }
  0x11   : > { %p775_p9 = pneg %p1140_p8  ;;  %s202_s6 = sshll.u32 %s1059_s30, 4  ;;  %s1155_s6 = int_to_ptr.vmem [resolvable:$true] %s202_s6 }
  0x12   : > { %p841_p12 = scmp.ne.s32.totalorder %s1431_s1, %s840_s9  ;;  %p847_p5 = scmp.lt.u32.totalorder %s840_s9, %s1431_s1 }
  0x13   : > { %p1151_p11 = pnand %p775_p9, %p1436_p1 }
  0x15   : > { %p842_p13 = pneg %p1151_p11 }
  0x17   : > { %p843_p0 = pnand %p842_p13, %p841_p12 }
  0x19   : > { %p844_p3 = pneg %p843_p0 }
  0x1b   : > { %p849_p7 = pnand %p847_p5, %p844_p3 }
  0x1d   : > { %852 = shalt.err (!%p849_p7)
}
  0x1e   : > { %s853_s14 = scalar_lea.vmem %s1144_s28, 256  ;;  %p861_p2 = scmp.lt.s32.totalorder %s1144_s28, %s1144_s28 }
  0x1f   : > { %p854_p9 = scmp.ne.s32.totalorder %s1144_s28, %s853_s14  ;;  %p862_p12 = scmp.lt.s32.totalorder %s853_s14, %s853_s14 }
  0x21   : > { %p856_p10 = pnand %p854_p9, %p842_p13  ;;  %p863_p0 = por %p862_p12, %p861_p2 }
  0x23   : > { %p857_p1 = pneg %p856_p10 }
  0x25   : > { %p864_p6 = pnand %p863_p0, %p857_p1 }
  0x27   : > { %867 = shalt.err (!%p864_p6)
}
  0x28   : > { %s1060_s15 = smov 128   ;;  %s1061_s16 = smov 8  }
  0x29   : > { %778 = dma.hbm_to_vmem [thread:$0]  (!%p1151_p11), %s1431_s1, 256, %s1144_s28, [#allocation6], %s1060_s15, %s1060_s15, %s1061_s16  }
  0x2a   : > { %s868_s8 = scalar_lea.hbm %s1432_s2, 256 }
  0x2b   : > { %p869_p1 = scmp.ne.s32.totalorder %s1432_s2, %s868_s8  ;;  %p875_p10 = scmp.lt.u32.totalorder %s868_s8, %s1432_s2 }
  0x2d   : > { %p871_p2 = pnand %p869_p1, %p842_p13 }
  0x2f   : > { %p872_p6 = pneg %p871_p2 }
  0x31   : > { %p877_p3 = pnand %p875_p10, %p872_p6 }
  0x33   : > { %880 = shalt.err (!%p877_p3)
}
  0x34   : > { %s881_s28 = scalar_lea.vmem %s1155_s6, 256  ;;  %p889_p12 = scmp.lt.s32.totalorder %s1155_s6, %s1155_s6 }
  0x35   : > { %p882_p5 = scmp.ne.s32.totalorder %s1155_s6, %s881_s28  ;;  %p890_p0 = scmp.lt.s32.totalorder %s881_s28, %s881_s28 }
  0x37   : > { %p884_p7 = pnand %p882_p5, %p842_p13  ;;  %p891_p1 = por %p890_p0, %p889_p12 }
  0x39   : > { %p885_p9 = pneg %p884_p7 }
  0x3b   : > { %p892_p2 = pnand %p891_p1, %p885_p9 }
  0x3d   : > { %895 = shalt.err (!%p892_p2)
}
  0x3e   : > { %781 = dma.hbm_to_vmem [thread:$0]  (!%p1151_p11), %s1432_s2, 256, %s1155_s6, [#allocation6], %s1060_s15, %s1060_s15, %s1061_s16  }
  0x3f   : > { %s1216_s29 = sadd.s32 1, %s1056_s21   ;;  %s33_s17 = sadd.s32 1, %s1052_s20 }
  0x40   : > { %s30_s27 = ssub.s32 %s1056_s21, %s1216_s29  ;;  %p40_p13 = scmp.ne.s32.totalorder %s1052_s20, %s1048_s19 }
  0x41   : > { %p31_p6 = scmp.eq.s32.totalorder %s30_s27, 0  ;;  %p41_p10 = scmp.eq.s32.totalorder %s1056_s21, 0 }
  0x42   : > { %p1443_p3 = scmp.eq.s32.totalorder %s1119_s22, 1  ;;  %p798_p7 = scmp.lt.s32.totalorder %s1056_s21, 2 }
  0x43   : > { %s1232_s7 = scalar_select %p31_p6, %s1052_s20, %s33_s17  }
  0x44   : > { %p1226_p5 = por %p1443_p3, %p40_p13  ;;  %p42_p9 = por %p41_p10, %p40_p13 }
  0x45   : > { %s216_s8 = sand.u32 1, %s1052_s20   ;;  %s723_s6 = sshll.u32 %s1056_s21, 8 }
  0x46   : > { %s1444_s30 = scalar_select %p1226_p5, 1, 0 }
  0x47   : > { %s700_s9 = sshll.u32 %s216_s8, 4  ;;  %s1239_s12 = scalar_lea.hbm %s1430_s0, %s723_s6 }
  0x48   : > { %s220_s28 = scalar_lea.vmem [#allocation2], %s700_s9  ;;  %p1243_p11 = pnand %p798_p7, %p42_p9 }
  0x49   : > { %s227_s13 = sshll.u32 %s220_s28, 4  ;;  %s1247_s17 = scalar_lea.sflag [#allocation3], %s216_s8  ;;  %s1241_s13 = int_to_ptr.vmem [resolvable:$true] %s227_s13 }
  0x4a   : > { %s896_s27 = scalar_lea.hbm %s1239_s12, 256  ;;  %p898_p0 = pneg %p1243_p11 }
  0x4b   : > { %p897_p12 = scmp.ne.s32.totalorder %s1239_s12, %s896_s27  ;;  %s901_s10 = scalar_lea.hbm %s1430_s0, 512 }
  0x4c   : > { %p902_p13 = scmp.lt.u32.totalorder %s1239_s12, %s1430_s0  ;;  %p903_p6 = scmp.lt.u32.totalorder %s901_s10, %s896_s27 }
  0x4d   : > { %p899_p1 = pnand %p898_p0, %p897_p12  ;;  %p905_p3 = scmp.lt.u32.totalorder %s896_s27, %s1239_s12 }
  0x4e   : > { %p904_p10 = por %p903_p6, %p902_p13 }
  0x4f   : > { %p900_p2 = pneg %p899_p1 }
  0x50   : > { %p906_p7 = por %p905_p3, %p904_p10 }
  0x52   : > { %p907_p9 = pnand %p906_p7, %p900_p2 }
  0x54   : > { %910 = shalt.err (!%p907_p9)
}
  0x55   : > { %s911_s8 = scalar_lea.vmem %s1241_s13, 256  ;;  %s1062_s9 = smov [#allocation2]  }
  0x56   : > { %p912_p12 = scmp.ne.s32.totalorder %s1241_s13, %s911_s8  ;;  %s916_s6 = sshll.u32 %s1062_s9, 4  ;;  %s917_s6 = int_to_ptr.vmem [resolvable:$false] %s916_s6 }
  0x57   : > { %s918_s11 = scalar_lea.vmem %s917_s6, 512  ;;  %p919_p4 = scmp.lt.s32.totalorder %s1241_s13, %s917_s6 }
  0x58   : > { %p914_p1 = pnand %p912_p12, %p898_p0  ;;  %p920_p13 = scmp.lt.s32.totalorder %s918_s11, %s911_s8 }
  0x5a   : > { %p915_p5 = pneg %p914_p1  ;;  %p921_p6 = por %p920_p13, %p919_p4 }
  0x5c   : > { %p922_p10 = pnand %p921_p6, %p915_p5 }
  0x5e   : > { %925 = shalt.err (!%p922_p10)
}
  0x5f   : > { %785 = dma.hbm_to_vmem [thread:$0]  (!%p1243_p11), %s1239_s12, 256, %s1241_s13, %s1247_s17, %s1060_s15, %s1060_s15, %s1061_s16  }
  0x60   : > { %239 = sbr.rel (%p1140_p8) target bundleno = 793 (0x319), region = 32  ;;  %s1281_s27 = sand.u32 (!%p1140_p8), 1, %s1048_s19  }
  0x61   : > { %s704_s10 = sshll.u32 (!%p1140_p8), %s1281_s27, 4  ;;  %s242_s28 = scalar_lea.sflag (!%p1140_p8), [#allocation3], %s1281_s27 }
  0x62   : > { %s245_s8 = scalar_lea.vmem (!%p1140_p8), [#allocation2], %s704_s10  ;;  %p1446_p4 = scmp.ne.s32.totalorder (!%p1140_p8), %s1439_s24, 0 }
  0x67   : > { %1027 = dma.done.wait (%p1446_p4), %s242_s28, 256  }
  0x68   : > { %1029 = vsyncadd (%p1446_p4), %s242_s28, 4294967040  ;;  %p1447_p5 = scmp.eq.s32.totalorder %s1119_s22, 0 }
  0x6a   : > { %1031 = dma.done.wait (%p1447_p5), [#allocation6], 512   ;;  %p1448_p11 = pmov %p1447_p5 }
  0x6b   : > { %vm296_vm0 = vcmask 130048   ;;  %v294_v0 = vld [vmem:[%s245_s8] sm:$0xff]  ;;  %v295_v1 = vld [vmem:[%s245_s8 + $0x8] sm:$0xff]  ;;  %s275_s24 = scalar_lea.vmem [#allocation8], %s704_s10  ;;  %s724_s15 = sshll.u32 %s1119_s22, 8 }
  0x6c   : > { %1033 = vsyncadd (%p1448_p11), [#allocation6], 4294966784  ;;  %v290_v2 = vld [vmem:[#allocation5] sm:$0xff]  ;;  %v747_v3 = vpack.c.bf16 %v295_v1, %v294_v0  ;;  %v292_v4 = vld [vmem:[#allocation7] sm:$0xff]  ;;  %s516_s26 = sshll.u32 %s275_s24, 4  ;;  %s1309_s13 = scalar_lea.hbm %s1433_s3, %s724_s15  ;;  %s1303_s26 = int_to_ptr.vmem [resolvable:$true] %s516_s26 }
  0x6d   : > { %737 = vmatprep.mubr.msk.f32.mxu0 %vm296_vm0, %v290_v2  ;;  %v293_v5 = vld [vmem:[#allocation7 + $0x8] sm:$0xff]  ;;  %v291_v7 = vld [vmem:[#allocation5 + $0x8] sm:$0xff]  ;;  %s493_s14 = scalar_lea.sflag [#allocation4], %s1281_s27  ;;  %s926_s17 = scalar_lea.vmem %s1303_s26, 256 }
  0x6e   : > { %v751_v6 = vpack.c.bf16 %v293_v5, %v292_v4  ;;  %748 = vmatprep.subr.bf16.mxu0 %v747_v3  ;;  %p927_p8 = scmp.ne.s32.totalorder %s1303_s26, %s926_s17  ;;  %p1449_p0 = scmp.ne.s32.totalorder %s1444_s30, 0 }
  0x6f   : > { %750 = vmatpush3.bf16.msra.mxu0 %v747_v3  ;;  %s1063_s9 = smov [#allocation8]  }
  0x70   : > { %752 = vmatprep.subr.bf16.mxu1 %v751_v6  ;;  %p928_p2 = pnand %p927_p8, %p1449_p0  ;;  %s930_s6 = sshll.u32 %s1063_s9, 4  ;;  %s931_s6 = int_to_ptr.vmem [resolvable:$false] %s930_s6 }
  0x71   : > { %754 = vmatpush3.bf16.msra.mxu1 %v751_v6  ;;  %s932_s11 = scalar_lea.vmem %s931_s6, 512  ;;  %p933_p7 = scmp.lt.s32.totalorder %s1303_s26, %s931_s6 }
  0x72   : > { %738 = vmatmul.mubr.msk.f32.vlgmr.msra.gmra.mrb[0].mxu0 %vm296_vm0, %v291_v7  ;;  %p929_p3 = pneg %p928_p2  ;;  %p934_p9 = scmp.lt.s32.totalorder %s932_s11, %s926_s17 }
  0x74   : > { %p935_p12 = por %p934_p9, %p933_p7 }
  0x76   : > { %p936_p1 = pnand %p935_p12, %p929_p3 }
 0x145   : > { %v739_v8 = vpop.f32.mrb[0].mxu0 }
 0x146   : > { %v369_v9 = vpop.f32.mrb[1].mxu0 }
 0x147   : > { %744 = vmatprep.mubr.msk.f32.mxu1 %vm296_vm0, %v369_v9 }
 0x148   : > { %745 = vmatmul.mubr.msk.f32.vlgmr.msra.gmra.mrb[0].mxu1 %vm296_vm0, %v739_v8 }
 0x21b   : > { %v746_v10 = vpop.f32.mrb[0].mxu1 }
 0x21c   : > { %460 = vst.msk [vmem:[%s275_s24 + $0x8] sm:$0xff] %vm296_vm0, %v746_v10  ;;  %v450_v11 = vpop.f32.mrb[1].mxu1  ;;  %v463_v12 = vsel %vm296_vm0, %v746_v10, inf  ;;  %v476_v13 = vsel %vm296_vm0, %v746_v10, -inf }
 0x21d   : > { %459 = vst.msk [vmem:[%s275_s24] sm:$0xff] %vm296_vm0, %v450_v11  ;;  %v475_v14 = vsel %vm296_vm0, %v450_v11, -inf  ;;  %v462_v15 = vsel %vm296_vm0, %v450_v11, inf }
 0x21e   : > { %v464_v16 = vmin.f32 %v462_v15, %v463_v12  ;;  %v477_v17 = vmax.f32 %v475_v14, %v476_v13 }
 0x220   : > { %465 = vmin.xlane.f32.xlu0 %v464_v16 }
 0x224   : > { %478 = vmax.xlane.f32.xlu0 %v477_v17 }
 0x225   : > { %939 = shalt.err (!%p936_p1)
}
 0x226   : > { %s940_s10 = scalar_lea.hbm %s1309_s13, 256  ;;  %s944_s24 = scalar_lea.hbm %s1433_s3, 512 }
 0x227   : > { %p941_p13 = scmp.ne.s32.totalorder %s1309_s13, %s940_s10  ;;  %p945_p4 = scmp.lt.u32.totalorder %s1309_s13, %s1433_s3 }
 0x228   : > { %p946_p5 = scmp.lt.u32.totalorder %s944_s24, %s940_s10  ;;  %p948_p8 = scmp.lt.u32.totalorder %s940_s10, %s1309_s13 }
 0x229   : > { %p942_p6 = pnand %p941_p13, %p1449_p0 }
 0x22a   : > { %p947_p11 = por %p946_p5, %p945_p4 }
 0x22b   : > { %p943_p10 = pneg %p942_p6 }
 0x22c   : > { %p949_p2 = por %p948_p8, %p947_p11 }
 0x22e   : > { %p950_p3 = pnand %p949_p2, %p943_p10 }
 0x230   : > { %953 = shalt.err (!%p950_p3)
}
 0x231   : > { %s1064_s12 = smov 128   ;;  %s1065_s17 = smov 8  }
 0x232   : > { %769 = dma.vmem_to_hbm [thread:$0]  (%p1449_p0), %s1303_s26, 256, %s1309_s13, %s493_s14, %s1064_s12, %s1064_s12, %s1065_s17  }
 0x233   : > { %s708_s26 = sshll.u32 %s1281_s27, 3  ;;  %p461_p7 = scmp.lt.s32.totalorder %s1119_s22, 2 }
 0x234   : > { %s497_s13 = sand.u32 1, %s1119_s22   ;;  %s1338_s14 = scalar_lea.vmem [#allocation11], %s708_s26 }
 0x235   : > { %s545_s9 = sshll.u32 %s1338_s14, 4  ;;  %s719_s6 = sshll.u32 %s1119_s22, 7  ;;  %s1344_s9 = int_to_ptr.vmem [resolvable:$true] %s545_s9 }
 0x236   : > { %s282_s10 = scalar_lea.vmem [#allocation9], %s708_s26  ;;  %s1349_s27 = scalar_lea.hbm %s1434_s4, %s719_s6 }
 0x237   : > { %s532_s28 = sshll.u32 %s282_s10, 4  ;;  %s1356_s17 = scalar_lea.hbm %s1435_s5, %s719_s6  ;;  %s1351_s28 = int_to_ptr.vmem [resolvable:$true] %s532_s28 }
 0x238   : > { %s1362_s26 = scalar_lea.sflag [#allocation10], %s497_s13  ;;  %s1066_s8 = smov [#allocation9]  }
 0x239   : > { %s958_s24 = sshll.u32 %s1066_s8, 4  ;;  %s959_s24 = int_to_ptr.vmem [resolvable:$false] %s958_s24 }
 0x23a   : > { %p961_p13 = scmp.lt.s32.totalorder %s1351_s28, %s959_s24 }
 0x2ad   : > { %v466_v18 = vpop.xlane.xlu0 %465 }
 0x2ae   : > { %v467_v19 = vrot.slane %v466_v18, 4 }
 0x2b0   : > { %v468_v20 = vmin.f32 %v466_v18, %v467_v19 }
 0x2b1   : > { %v479_v21 = vpop.xlane.xlu0 %478 }
 0x2b2   : > { %v469_v22 = vrot.slane %v468_v20, 2  ;;  %v480_v23 = vrot.slane %v479_v21, 4 }
 0x2b4   : > { %v481_v24 = vmax.f32 %v479_v21, %v480_v23  ;;  %v470_v25 = vmin.f32 %v468_v20, %v469_v22 }
 0x2b6   : > { %v482_v26 = vrot.slane %v481_v24, 2  ;;  %v471_v27 = vrot.slane %v470_v25, 1 }
 0x2b8   : > { %v483_v28 = vmax.f32 %v481_v24, %v482_v26  ;;  %v472_v29 = vmin.f32 %v470_v25, %v471_v27 }
 0x2ba   : > { %755 = vpush %v472_v29  ;;  %v484_v30 = vrot.slane %v483_v28, 1 }
 0x2bc   : > { %v485_v31 = vmax.f32 %v483_v28, %v484_v30 }
 0x2be   : > { %757 = vpush %v485_v31 }
 0x2eb   : > { %s756_s11 = spop %755 }
 0x2ec   : > { %s1457_s11 = smov (!%p461_p7, %s756_s11), inf }
 0x2ed   : > { %v488_v32 = vstv %s1457_s11  ;;  %s954_s11 = scalar_lea.vmem %s1351_s28, 128 }
 0x2ee   : > { %489 = vst [vmem:[%s282_s10] sm:$0xff] %v488_v32  ;;  %p955_p9 = scmp.ne.s32.totalorder %s1351_s28, %s954_s11  ;;  %s960_s10 = scalar_lea.vmem %s959_s24, 256 }
 0x2ef   : > { %s758_s15 = spop %757  ;;  %p962_p6 = scmp.lt.s32.totalorder %s960_s10, %s954_s11 }
 0x2f0   : > { %s1459_s15 = smov (!%p461_p7, %s758_s15), -inf  ;;  %p956_p12 = pnand %p955_p9, %p1449_p0 }
 0x2f1   : > { %p963_p10 = por %p962_p6, %p961_p13 }
 0x2f2   : > { %p957_p1 = pneg %p956_p12 }
 0x2f4   : > { %p964_p4 = pnand %p963_p10, %p957_p1 }
 0x2f6   : > { %967 = shalt.err (!%p964_p4)
}
 0x2f7   : > { %s968_s22 = scalar_lea.hbm %s1349_s27, 128  ;;  %s972_s16 = scalar_lea.hbm %s1434_s4, 256 }
 0x2f8   : > { %p969_p5 = scmp.ne.s32.totalorder %s1349_s27, %s968_s22  ;;  %p973_p2 = scmp.lt.u32.totalorder %s1349_s27, %s1434_s4 }
 0x2f9   : > { %p974_p3 = scmp.lt.u32.totalorder %s972_s16, %s968_s22  ;;  %p976_p9 = scmp.lt.u32.totalorder %s968_s22, %s1349_s27 }
 0x2fa   : > { %p970_p11 = pnand %p969_p5, %p1449_p0 }
 0x2fb   : > { %p975_p7 = por %p974_p3, %p973_p2 }
 0x2fc   : > { %p971_p8 = pneg %p970_p11 }
 0x2fd   : > { %p977_p12 = por %p976_p9, %p975_p7 }
 0x2ff   : > { %p978_p1 = pnand %p977_p12, %p971_p8 }
 0x301   : > { %981 = shalt.err (!%p978_p1)
}
 0x302   : > { %770 = dma.vmem_to_hbm [thread:$0]  (%p1449_p0), %s1351_s28, 128, %s1349_s27, %s1362_s26   ;;  %v490_v33 = vstv %s1459_s15 }
 0x303   : > { %491 = vst [vmem:[%s1338_s14] sm:$0xff] %v490_v33  ;;  %s982_s11 = scalar_lea.vmem %s1344_s9, 128  ;;  %s1067_s24 = smov [#allocation11]  }
 0x304   : > { %p983_p13 = scmp.ne.s32.totalorder %s1344_s9, %s982_s11  ;;  %s986_s10 = sshll.u32 %s1067_s24, 4  ;;  %s987_s10 = int_to_ptr.vmem [resolvable:$false] %s986_s10 }
 0x305   : > { %s988_s22 = scalar_lea.vmem %s987_s10, 256  ;;  %p989_p4 = scmp.lt.s32.totalorder %s1344_s9, %s987_s10 }
 0x306   : > { %p984_p6 = pnand %p983_p13, %p1449_p0  ;;  %p990_p5 = scmp.lt.s32.totalorder %s988_s22, %s982_s11 }
 0x308   : > { %p985_p10 = pneg %p984_p6  ;;  %p991_p11 = por %p990_p5, %p989_p4 }
 0x30a   : > { %p992_p8 = pnand %p991_p11, %p985_p10 }
 0x30c   : > { %995 = shalt.err (!%p992_p8)
}
 0x30d   : > { %s996_s14 = scalar_lea.hbm %s1356_s17, 128  ;;  %s1000_s15 = scalar_lea.hbm %s1435_s5, 256 }
 0x30e   : > { %p997_p2 = scmp.ne.s32.totalorder %s1356_s17, %s996_s14  ;;  %p1001_p9 = scmp.lt.u32.totalorder %s1356_s17, %s1435_s5 }
 0x30f   : > { %p1002_p12 = scmp.lt.u32.totalorder %s1000_s15, %s996_s14  ;;  %p1004_p13 = scmp.lt.u32.totalorder %s996_s14, %s1356_s17 }
 0x310   : > { %p998_p3 = pnand %p997_p2, %p1449_p0 }
 0x311   : > { %p1003_p1 = por %p1002_p12, %p1001_p9 }
 0x312   : > { %p999_p7 = pneg %p998_p3 }
 0x313   : > { %p1005_p6 = por %p1004_p13, %p1003_p1 }
 0x315   : > { %p1006_p10 = pnand %p1005_p6, %p999_p7 }
 0x317   : > { %1009 = shalt.err (!%p1006_p10)
}
 0x318   : > { %771 = dma.vmem_to_hbm [thread:$0]  (%p1449_p0), %s1344_s9, 128, %s1356_s17, %s1362_s26  }
 0x319 PF: > { %s557_s16 = sand.u32 1, %s1044_s18   ;;  %p1450_p4 = scmp.ne.s32.totalorder %s1440_s25, 0 }
 0x31a   : > { %p1451_p5 = scmp.ge.s32.totalorder %s1056_s21, 2  ;;  %s558_s12 = scalar_lea.sflag [#allocation4], %s557_s16 }
 0x31c   : > { %p787_p11 = pnand %p1451_p5, %p1450_p4 }
 0x31e   : > { %1035 = dma.done.wait (!%p787_p11), %s558_s12, 256  }
 0x31f   : > { %1037 = vsyncadd (!%p787_p11), %s558_s12, 4294967040  ;;  %s566_s8 = sand.u32 1, %s695_s23  }
 0x320   : > { %s567_s11 = scalar_lea.sflag [#allocation10], %s566_s8 }
 0x321   : > { %1039 = dma.done.wait (!%p787_p11), %s567_s11, 256  }
 0x322   : > { %1041 = vsyncadd (!%p787_p11), %s567_s11, 4294967040  ;;  %p23_p0 = scmp.ge.s32.totalorder %s1216_s29, 4   ;;  %s1452_s18 = smov %s1048_s19 }
 0x323   : > { %s1453_s19 = smov %s1052_s20  ;;  %s1454_s20 = smov %s1232_s7 }
 0x324   : > { %s1455_s21 = smov %s1216_s29  ;;  %25 = sbr.rel (!%p23_p0) target bundleno = 8 (0x8), region = 117 }
 0x32b   :  { %581 = vsyncpa [#allocation3], 1 }
 0x32c   :  { %583 = vsyncpa [#allocation3 + $0x1], 1 }
 0x32d   :  { %584 = vsyncpa [#allocation6], 1 }
 0x32e   :  { %585 = vsyncpa [#allocation4], 1 }
 0x32f   :  { %587 = vsyncpa [#allocation4 + $0x1], 1 }
 0x330   :  { %588 = vsyncpa [#allocation10], 1 }
 0x331   :  { %590 = vsyncpa [#allocation10 + $0x1], 1 }

</bundles_post_ra>
